<compile_context>
chip_gen: v5e
topology: v5e:2x2
jax: 0.10.0
libtpu: 0.0.40
codegen_flags: <defaults>
</compile_context>

<pallas_src>
import jax
import jax.numpy as jnp
from jax.experimental import pallas as pl
from jax.experimental.pallas import tpu as pltpu


_LANE = 128
# Max rows-of-128 per grid step: 2048 rows * 128 lanes * 4 B * 3 ch = 3 MiB input,
# 1 MiB output per step; double buffered ~8 MiB.
_S_MAX = 2048
# Soft cap on per-step input bytes when packing multiple images per step.
_BATCH_BLOCK_INPUT_BYTES = 2 * 1024 * 1024


def _round_up(a: int, m: int) -> int:
    return ((a + m - 1) // m) * m


def _sublane(itemsize: int) -> int:
    # f32 -> 8, bf16/f16 -> 16, int8/fp8 -> 32 rows per native tile.
    return max(8, 32 // min(4, max(1, itemsize)))


def _choose_tiling(B: int, rows_needed: int, itemsize: int):
    """Pick (Bt, S, rows_padded) for the (B, 3, rows, 128) layout."""
    sub = _sublane(itemsize)
    if rows_needed > _S_MAX:
        # Large images: many spatial steps; pad rows so every tile is full.
        S = _S_MAX
        return 1, S, _round_up(rows_needed, S)

    # Whole image fits in one spatial tile.
    S = _round_up(max(rows_needed, 1), sub)
    if B == 1:
        # Megacore (v7x): give the grid >= 2 steps when there is enough data.
        if rows_needed > sub:
            S = _round_up(pl.cdiv(rows_needed, 2), sub)
        return 1, S, _round_up(rows_needed, S)

    rows = S  # single spatial tile per image
    # Pack several images per step for tiny images, but keep the per-step
    # input block modest and leave >= 2 batch steps for megacore splitting.
    per_img_bytes = 3 * S * _LANE * itemsize
    bt_cap = max(1, _BATCH_BLOCK_INPUT_BYTES // per_img_bytes)
    bt_cap = min(bt_cap, max(1, B // 2))
    Bt = 1
    for d in range(min(bt_cap, B), 0, -1):
        if B % d == 0:
            Bt = d
            break
    return Bt, S, rows


def _rgb_to_gray_kernel(x_ref, o_ref):
    # x_ref: (Bt, 3, S, 128) VMEM tile, o_ref: (Bt, 1, S, 128) VMEM tile.
    # Static channel slices are zero-cost views; each is a dense (Bt,1,S,128) tile.
    r = x_ref[:, 0:1].astype(jnp.float32)
    g = x_ref[:, 1:2].astype(jnp.float32)
    b = x_ref[:, 2:3].astype(jnp.float32)
    gray = 0.299 * r + 0.587 * g + 0.11 * b
    o_ref[...] = gray.astype(o_ref.dtype)


def rgb_to_grayscale(x: jax.Array) -> jax.Array:
    """Pallas equivalent of kornia.color.rgb_to_grayscale (forward).

    Args:
        x: RGB image of shape (*, 3, H, W).

    Returns:
        Grayscale image of shape (*, 1, H, W), same dtype as input.
    """
    if x.ndim < 3 or x.shape[-3] != 3:
        raise ValueError(
            "Input size must have a shape of (*, 3, H, W). Got {}".format(x.shape)
        )

    lead = x.shape[:-3]
    H, W = x.shape[-2], x.shape[-1]
    HW = H * W
    itemsize = jnp.dtype(x.dtype).itemsize

    # Flatten leading dims to one batch axis, spatial dims to one axis.
    xb = x.reshape((-1, 3, HW))
    B = xb.shape[0]

    rows_needed = pl.cdiv(HW, _LANE)
    Bt, S, rows = _choose_tiling(B, rows_needed, itemsize)
    HW_pad = rows * _LANE
    n_b = B // Bt
    n_r = rows // S

    # Pad the flattened spatial axis so every tile is a full (S, 128) block
    # (unmasked loads/stores, aligned DMAs); sliced back off below.
    if HW_pad != HW:
        xb = jnp.pad(xb, ((0, 0), (0, 0), (0, HW_pad - HW)))
    x4 = xb.reshape((B, 3, rows, _LANE))

    out = pl.pallas_call(
        _rgb_to_gray_kernel,
        out_shape=jax.ShapeDtypeStruct((B, 1, rows, _LANE), x.dtype),
        grid=(n_b, n_r),
        in_specs=[pl.BlockSpec((Bt, 3, S, _LANE), lambda i, j: (i, 0, j, 0))],
        out_specs=pl.BlockSpec((Bt, 1, S, _LANE), lambda i, j: (i, 0, j, 0)),
        compiler_params=pltpu.CompilerParams(
            dimension_semantics=("parallel", "parallel"),
        ),
    )(x4)

    out = out.reshape((B, 1, HW_pad))
    if HW_pad != HW:
        out = out[:, :, :HW]
    return out.reshape(lead + (1, H, W))


class RgbToGrayscale:
    """Stateless module mirroring kornia.color.RgbToGrayscale (no params)."""

    def __call__(self, x: jax.Array) -> jax.Array:
        return rgb_to_grayscale(x)


def _ref_gray(x):
    return 0.299 * x[..., 0:1, :, :] + 0.587 * x[..., 1:2, :, :] + 0.11 * x[..., 2:3, :, :]


if __name__ == "__main__":
    key = jax.random.PRNGKey(0)
    module = RgbToGrayscale()

    # Module implies (B, 3, H, W) input; small deterministic example.
    x = jax.random.uniform(key, (2, 3, 16, 16), dtype=jnp.float32)
    gray = jax.block_until_ready(module(x))
    ref = _ref_gray(x)
    assert gray.shape == (2, 1, 16, 16), gray.shape
    assert gray.dtype == x.dtype
    assert jnp.allclose(gray, ref, atol=1e-6), float(jnp.max(jnp.abs(gray - ref)))

    # Non-128-aligned, multi-image case with extra leading dims.
    x2 = jax.random.uniform(jax.random.PRNGKey(1), (1, 2, 3, 24, 20), dtype=jnp.float32)
    g2 = jax.block_until_ready(rgb_to_grayscale(x2))
    ref2 = _ref_gray(x2)
    assert g2.shape == (1, 2, 1, 24, 20), g2.shape
    assert jnp.allclose(g2, ref2, atol=1e-6), float(jnp.max(jnp.abs(g2 - ref2)))

    # Single image (exercises the megacore spatial split) in bf16.
    x3 = jax.random.uniform(jax.random.PRNGKey(2), (3, 32, 48), dtype=jnp.bfloat16)
    g3 = jax.block_until_ready(rgb_to_grayscale(x3))
    ref3 = _ref_gray(x3.astype(jnp.float32)).astype(jnp.bfloat16)
    assert g3.shape == (1, 32, 48), g3.shape
    assert jnp.allclose(g3.astype(jnp.float32), ref3.astype(jnp.float32), atol=2e-2)

    print("KERNEL_OK")
</pallas_src>

<mosaic_0001>
module attributes {stable_mosaic.version = 11 : i64} {
  func.func @_rgb_to_gray_kernel(%arg0: i32, %arg1: i32, %arg2: memref<1x3x8x128xf32, #tpu.memory_space<vmem>>, %arg3: memref<1x1x8x128xf32, #tpu.memory_space<vmem>>) attributes {dimension_semantics = [#tpu.dimension_semantics<parallel>, #tpu.dimension_semantics<parallel>], iteration_bounds = array<i64: 2, 1>, scalar_prefetch = 0 : i64, scratch_operands = 0 : i64, tpu.core_type = #tpu.core_type<tc>, window_params = [{transform_indices = @transform_0, window_bounds = array<i64: 1, 3, 8, 128>}, {transform_indices = @transform_1, window_bounds = array<i64: 1, 1, 8, 128>}]} {
    %c0 = arith.constant 0 : index
    %c0_0 = arith.constant 0 : index
    %c0_1 = arith.constant 0 : index
    %c0_2 = arith.constant 0 : index
    %0 = vector.load %arg2[%c0, %c0_0, %c0_1, %c0_2] : memref<1x3x8x128xf32, #tpu.memory_space<vmem>>, vector<1x1x8x128xf32>
    %c0_3 = arith.constant 0 : index
    %c1 = arith.constant 1 : index
    %c0_4 = arith.constant 0 : index
    %c0_5 = arith.constant 0 : index
    %1 = vector.load %arg2[%c0_3, %c1, %c0_4, %c0_5] : memref<1x3x8x128xf32, #tpu.memory_space<vmem>>, vector<1x1x8x128xf32>
    %c0_6 = arith.constant 0 : index
    %c2 = arith.constant 2 : index
    %c0_7 = arith.constant 0 : index
    %c0_8 = arith.constant 0 : index
    %2 = vector.load %arg2[%c0_6, %c2, %c0_7, %c0_8] : memref<1x3x8x128xf32, #tpu.memory_space<vmem>>, vector<1x1x8x128xf32>
    %cst = arith.constant 2.990000e-01 : f32
    %3 = vector.broadcast %cst : f32 to vector<1x1x8x128xf32>
    %4 = arith.mulf %3, %0 : vector<1x1x8x128xf32>
    %cst_9 = arith.constant 5.870000e-01 : f32
    %5 = vector.broadcast %cst_9 : f32 to vector<1x1x8x128xf32>
    %6 = arith.mulf %5, %1 : vector<1x1x8x128xf32>
    %7 = arith.addf %4, %6 : vector<1x1x8x128xf32>
    %cst_10 = arith.constant 1.100000e-01 : f32
    %8 = vector.broadcast %cst_10 : f32 to vector<1x1x8x128xf32>
    %9 = arith.mulf %8, %2 : vector<1x1x8x128xf32>
    %10 = arith.addf %7, %9 : vector<1x1x8x128xf32>
    %c0_11 = arith.constant 0 : index
    %c0_12 = arith.constant 0 : index
    %c0_13 = arith.constant 0 : index
    %c0_14 = arith.constant 0 : index
    %11 = vector.load %arg3[%c0_11, %c0_12, %c0_13, %c0_14] : memref<1x1x8x128xf32, #tpu.memory_space<vmem>>, vector<1x1x8x128xf32>
    tpu.vector_store %arg3[%c0_11, %c0_12, %c0_13, %c0_14], %10 {strides = array<i32>} : memref<1x1x8x128xf32, #tpu.memory_space<vmem>>, vector<1x1x8x128xf32>,
    return
  }
  func.func @transform_0(%arg0: i32, %arg1: i32) -> (i32, i32, i32, i32) {
    %c0_i32 = arith.constant 0 : i32
    %c0_i32_0 = arith.constant 0 : i32
    %c0_i32_1 = arith.constant 0 : i32
    return %arg0, %c0_i32, %arg1, %c0_i32_0 : i32, i32, i32, i32
  }
  func.func @transform_1(%arg0: i32, %arg1: i32) -> (i32, i32, i32, i32) {
    %c0_i32 = arith.constant 0 : i32
    %c0_i32_0 = arith.constant 0 : i32
    %c0_i32_1 = arith.constant 0 : i32
    return %arg0, %c0_i32, %arg1, %c0_i32_0 : i32, i32, i32, i32
  }
}

</mosaic_0001>

<bundles_post_ra>
// kernel: tpu_custom_call.1
= control target key start
LH: loop header
LB: loop body
LE: loop exit
PB: predicated region body
PF: predicated region fallthrough
CT: control target
= control target key end

     0   :  { %6 = vsyncpa [#allocation3], 0  ;;  %s590_s0 = inlined_call_operand.hbm [shape: f32[2,3,8,128], index: 0, kind: input, shape index: {}]   ;;  %s591_s1 = inlined_call_operand.hbm [shape: f32[2,1,8,128], index: 1, kind: output, shape index: {}]  }
   0x1   :  { %8 = vsyncpa [#allocation3 + $0x1], 0 }
   0x2   :  { %9 = vsyncpa [#allocation4], 0 }
   0x3   :  { %11 = vsyncpa [#allocation4 + $0x1], 0  ;;  %s469_s6 = smov 0   ;;  %s471_s7 = smov 0  }
   0x4   :  { %s473_s8 = smov 0   ;;  %s475_s9 = smov 0  }
   0x5   :  { %s477_s10 = smov 0   ;;  %s479_s11 = smov 0  }
   0x6 LB: > { %s263_s12 = sadd.s32 4294967295, %s455_s11   ;;  %s264_s13 = sadd.s32 4294967294, %s455_s11   ;;  %s455_s11 = sphi %s479_s11, %s17_s11   ;;  %s451_s10 = sphi %s477_s10, %s600_s10   ;;  %s447_s9 = sphi %s475_s9, %s599_s9   ;;  %s443_s8 = sphi %s473_s8, %s598_s8   ;;  %s439_s7 = sphi %s471_s7, %s597_s7   ;;  %s435_s6 = sphi %s469_s6, %s596_s6  }
   0x7   : > { %s29_s14 = sadd.s32 1, %s451_s10  ;;  %s38_s15 = sadd.s32 1, %s443_s8 }
   0x8   : > { %p31_p0 = scmp.ge.s32.totalorder %s29_s14, 2  ;;  %p45_p1 = scmp.ne.s32.totalorder %s443_s8, %s439_s7 }
   0x9   : > { %p46_p2 = scmp.eq.s32.totalorder %s455_s11, 0  ;;  %p51_p3 = scmp.ne.s32.totalorder %s439_s7, %s435_s6 }
   0xa   : > { %s602_s14 = smov (%p31_p0, %s29_s14), 0  ;;  %p52_p5 = scmp.eq.s32.totalorder %s263_s12, 0 }
   0xb   : > { %p510_p4 = por %p46_p2, %p45_p1  ;;  %s33_s17 = ssub.s32 %s451_s10, %s602_s14 }
   0xc   : > { %p77_p6 = scmp.eq.s32.totalorder %s263_s12, 1  ;;  %p36_p7 = scmp.eq.s32.totalorder %s33_s17, 0 }
   0xd   : > { %p516_p8 = por %p52_p5, %p51_p3  ;;  %p83_p10 = scmp.eq.s32.totalorder %s264_s13, 1 }
   0xe   : > { %p520_p9 = por %p77_p6, %p45_p1  ;;  %p266_p12 = scmp.ge.s32.totalorder %s455_s11, 2 }
   0xf   : > { %s525_s20 = scalar_select %p36_p7, %s443_s8, %s38_s15  }
  0x10   : > { %p527_p11 = por %p83_p10, %p51_p3  ;;  %p291_p13 = scmp.lt.s32.totalorder %s455_s11, 2 }
  0x11   : > { %s103_s22 = sand.u32 1, %s443_s8   ;;  %s277_s24 = smul.u32 24, %s451_s10 }
  0x12   : > { %s276_s23 = smul.u32 24, %s103_s22  ;;  %p284_p0 = pnand %p291_p13, %p510_p4 }
  0x13   : > { %s113_s27 = scalar_lea.hbm %s590_s0, %s277_s24  ;;  %p268_p1 = scmp.ge.s32.totalorder %s455_s11, 1 }
  0x14   : > { %s107_s28 = scalar_lea.vmem [#allocation2], %s276_s23  ;;  %s114_s30 = sshll.u32 %s113_s27, 4  ;;  %s115_s30 = int_to_ptr.hbm [resolvable:$true] %s114_s30 }
  0x15   : > { %s116_s29 = sshll.u32 %s107_s28, 4  ;;  %s104_s2 = scalar_lea.sflag [#allocation3], %s103_s22  ;;  %s117_s29 = int_to_ptr.vmem [resolvable:$true] %s116_s29 }
  0x16   : > { %s457_s3 = smov 128   ;;  %s458_s4 = smov 8  }
  0x17   : > { %286 = dma.hbm_to_vmem [thread:$0]  (!%p284_p0), %s115_s30, 384, %s117_s29, %s104_s2, %s457_s3, %s457_s3, %s458_s4  }
  0x18   : > { %p124_p2 = scmp.lt.s32.totalorder %s455_s11, 3 }
  0x1a   : > { %p125_p3 = pnand %p268_p1, %p124_p2 }
  0x1b   : > { %s543_s5 = sand.u32 (!%p125_p3), 1, %s439_s7  }
  0x1c   : > { %128 = sbr.rel (%p125_p3) target bundleno = 49 (0x31), region = 24  ;;  %s131_s13 = scalar_lea.sflag (!%p125_p3), [#allocation3], %s543_s5 }
  0x1d   : > { %s278_s12 = smul.u32 (!%p125_p3), 24, %s543_s5 }
  0x1f   : > { %s134_s15 = scalar_lea.vmem (!%p125_p3), [#allocation2], %s278_s12 }
  0x21   : > { %426 = dma.done.wait (%p516_p8), %s131_s13, 384  }
  0x22   : > { %428 = vsyncadd (%p516_p8), %s131_s13, 4294966912  ;;  %s269_s16 = sshll.u32 %s543_s5, 3  ;;  %s273_s17 = sshll.u32 %s447_s9, 3  ;;  %v154_v0 = vld [vmem:[%s134_s15] sm:$0xff]  ;;  %v270_v1 = vld [vmem:[%s134_s15 + $0x8] sm:$0xff] }
  0x23   : > { %s177_s24 = scalar_lea.hbm %s591_s1, %s273_s17  ;;  %v271_v2 = vld [vmem:[%s134_s15 + $0x10] sm:$0xff]  ;;  %v159_v3 = vmul.f32 0.299, %v154_v0  ;;  %v160_v4 = vmul.f32 0.587, %v270_v1  ;;  %s153_s25 = scalar_lea.vmem [#allocation5], %s269_s16 }
  0x24   : > { %v162_v5 = vmul.f32 0.11, %v271_v2  ;;  %s179_s26 = sshll.u32 %s153_s25, 4  ;;  %s181_s18 = sshll.u32 %s177_s24, 4  ;;  %s180_s26 = int_to_ptr.vmem [resolvable:$true] %s179_s26  ;;  %s182_s18 = int_to_ptr.hbm [resolvable:$true] %s181_s18 }
  0x25   : > { %v161_v6 = vadd.f32 %v160_v4, %v159_v3  ;;  %s166_s9 = scalar_lea.sflag [#allocation4], %s543_s5  ;;  %s387_s27 = sshra.s32 %s182_s18, 4  ;;  %s388_s27 = int_to_ptr.hbm [resolvable:$true] %s387_s27 }
  0x26   : > { %s389_s28 = scalar_lea.hbm %s388_s27, 8  ;;  %s393_s2 = scalar_lea.hbm %s591_s1, 16 }
  0x27   : > { %v163_v7 = vadd.f32 %v162_v5, %v161_v6  ;;  %p390_p4 = scmp.ne.s32.totalorder %s388_s27, %s389_s28  ;;  %p394_p7 = scmp.lt.s32.totalorder %s388_s27, %s591_s1 }
  0x28   : > { %p395_p8 = scmp.lt.s32.totalorder %s393_s2, %s389_s28 }
  0x29   : > { %164 = vst [vmem:[%s153_s25] sm:$0xff] %v163_v7  ;;  %p391_p5 = pnand %p390_p4, %p520_p9 }
  0x2a   : > { %p396_p10 = por %p395_p8, %p394_p7 }
  0x2b   : > { %p392_p6 = pneg %p391_p5 }
  0x2d   : > { %p397_p13 = pnand %p396_p10, %p392_p6 }
  0x2f   : > { %400 = shalt.err (!%p397_p13)
}
  0x30   : > { %281 = dma.vmem_to_hbm [thread:$0]  (%p520_p9), %s180_s26, 128, %s182_s18, %s166_s9  }
  0x31 PF: > { %s193_s5 = sand.u32 1, %s435_s6   ;;  %p288_p0 = pnand %p266_p12, %p527_p11 }
  0x32   : > { %s194_s12 = scalar_lea.sflag [#allocation4], %s193_s5 }
  0x33   : > { %p289_p1 = pneg %p288_p0 }
  0x35   : > { %430 = dma.done.wait (%p289_p1), %s194_s12, 128  }
  0x36   : > { %432 = vsyncadd (%p289_p1), %s194_s12, 4294967168  ;;  %s17_s11 = sadd.s32 1, %s455_s11   ;;  %s596_s6 = smov %s439_s7 }
  0x37   : > { %p14_p2 = scmp.ge.s32.totalorder %s17_s11, 4   ;;  %s597_s7 = smov %s443_s8 }
  0x38   : > { %s598_s8 = smov %s525_s20  ;;  %s599_s9 = smov %s451_s10 }
  0x39   : > { %s600_s10 = smov %s602_s14  ;;  %16 = sbr.rel (!%p14_p2) target bundleno = 6 (0x6), region = 71 }
  0x3e   :  { %200 = vsyncpa [#allocation3], 1 }
  0x3f   :  { %202 = vsyncpa [#allocation3 + $0x1], 1 }
  0x40   :  { %203 = vsyncpa [#allocation4], 1 }
  0x41   :  { %205 = vsyncpa [#allocation4 + $0x1], 1 }

</bundles_post_ra>
